<compile_context>
chip_gen: v6e
topology: v6e:2x2x1
jax: 0.10.0
libtpu: 0.0.40
codegen_flags: <defaults>
</compile_context>

<pallas_src>
import functools

import jax
import jax.numpy as jnp
from jax.experimental import pallas as pl
from jax.experimental.pallas import tpu as pltpu


def _linear_kernel(x_ref, wt_ref, b_ref, o_ref):
    # x: (TB, IN), wt: (IN, C) in MXU-native [K, N] layout, b: (1, C).
    acc = jnp.dot(x_ref[...], wt_ref[...], preferred_element_type=jnp.float32)
    o_ref[...] = (acc + b_ref[...]).astype(o_ref.dtype)


def prepare_params(weight, bias):
    """One-time parameter prep (call at module init, NOT per forward).

    weight: (C, IN) in PyTorch (out, in) layout -> (IN, C) so the kernel feeds
    the MXU in native [M,K]x[K,N] order.  bias: (C,) -> (1, C) broadcast row.
    """
    return jnp.asarray(weight).T, jnp.asarray(bias).reshape(1, -1)


@functools.partial(jax.jit, static_argnames=("row_tile", "single_shot_rows"))
def musicgen_forward(x, w_t, b_row, *, row_tile=1024, single_shot_rows=8192):
    """x: (B, IN) f32; w_t: (IN, C) f32; b_row: (1, C) f32 -> (B, C) logits."""
    B, IN = x.shape
    IN_w, C = w_t.shape
    assert IN == IN_w, "feature dims must match"
    assert b_row.shape == (1, C)

    if B == 0:
        return jnp.zeros((0, C), x.dtype)

    cost = pl.CostEstimate(
        flops=2 * B * IN * C,
        transcendentals=0,
        bytes_accessed=4 * (B * IN + IN * C + C + B * C),
    )

    if B <= max(single_shot_rows, 2 * row_tile):
        # Single-shot, no grid: all operands resident in VMEM (B=8192 is only
        # ~3.4 MiB of x), minimal fixed overhead, no pipeline bookkeeping.
        return pl.pallas_call(
            _linear_kernel,
            out_shape=jax.ShapeDtypeStruct((B, C), x.dtype),
            in_specs=[
                pl.BlockSpec(memory_space=pltpu.MemorySpace.VMEM),
                pl.BlockSpec(memory_space=pltpu.MemorySpace.VMEM),
                pl.BlockSpec(memory_space=pltpu.MemorySpace.VMEM),
            ],
            out_specs=pl.BlockSpec(memory_space=pltpu.MemorySpace.VMEM),
            cost_estimate=cost,
        )(x, w_t, b_row)

    # Row-tiled grid for very large batches.  Because the single-shot
    # threshold is >= 2*row_tile, this path always has n_tiles >= 2, so the
    # "parallel" axis keeps both v7x TensorCores busy.
    n_tiles = pl.cdiv(B, row_tile)
    return pl.pallas_call(
        _linear_kernel,
        out_shape=jax.ShapeDtypeStruct((B, C), x.dtype),
        grid=(n_tiles,),
        in_specs=[
            pl.BlockSpec((row_tile, IN), lambda i: (i, 0)),  # x rows; K = full dim
            pl.BlockSpec((IN, C), lambda i: (0, 0)),         # loop-invariant weight
            pl.BlockSpec((1, C), lambda i: (0, 0)),          # bias row
        ],
        out_specs=pl.BlockSpec((row_tile, C), lambda i: (i, 0)),
        compiler_params=pltpu.CompilerParams(
            dimension_semantics=("parallel",)),
        cost_estimate=cost,
    )(x, w_t, b_row)


if __name__ == "__main__":
    NUM_CLASSES = 10
    IN_FEATURES = 100  # fixed by the module: nn.Linear(100, num_classes)

    key = jax.random.PRNGKey(0)
    kx, kw, kb, kx2 = jax.random.split(key, 4)

    # Deterministic parameter init (mimics nn.Linear's uniform fan-in scale).
    bound = 1.0 / jnp.sqrt(IN_FEATURES)
    weight = jax.random.uniform(kw, (NUM_CLASSES, IN_FEATURES),
                                minval=-bound, maxval=bound, dtype=jnp.float32)
    bias = jax.random.uniform(kb, (NUM_CLASSES,),
                              minval=-bound, maxval=bound, dtype=jnp.float32)

    # One-time parameter prep (init time, not per call).
    w_t, b_row = prepare_params(weight, bias)

    # Small batch -> single un-gridded VMEM-resident pallas_call.
    x_small = jax.random.normal(kx, (8, IN_FEATURES), dtype=jnp.float32)
    out_small = musicgen_forward(x_small, w_t, b_row)
    jax.block_until_ready(out_small)
    ref_small = x_small @ weight.T + bias
    assert out_small.shape == (8, NUM_CLASSES)
    assert jnp.allclose(out_small, ref_small, atol=1e-5, rtol=1e-5)

    # Exercise the row-tiled "parallel" grid path by lowering the thresholds
    # (keeps test shapes small while still covering the large-batch code path).
    x_big = jax.random.normal(kx2, (512, IN_FEATURES), dtype=jnp.float32)
    out_big = musicgen_forward(x_big, w_t, b_row,
                               row_tile=128, single_shot_rows=128)
    jax.block_until_ready(out_big)
    ref_big = x_big @ weight.T + bias
    assert out_big.shape == (512, NUM_CLASSES)
    assert jnp.allclose(out_big, ref_big, atol=1e-4, rtol=1e-4)

    # With default thresholds B=512 now takes the cheaper single-shot path.
    out_default = musicgen_forward(x_big, w_t, b_row)
    jax.block_until_ready(out_default)
    assert jnp.allclose(out_default, ref_big, atol=1e-4, rtol=1e-4)

    print("KERNEL_OK")
</pallas_src>

<mosaic_0001>
module attributes {stable_mosaic.version = 11 : i64} {
  func.func @_linear_kernel(%arg0: memref<8x100xf32, #tpu.memory_space<vmem>>, %arg1: memref<100x10xf32, #tpu.memory_space<vmem>>, %arg2: memref<1x10xf32, #tpu.memory_space<vmem>>, %arg3: memref<8x10xf32, #tpu.memory_space<vmem>>) attributes {dimension_semantics = [], scalar_prefetch = 0 : i64, scratch_operands = 0 : i64, tpu.core_type = #tpu.core_type<tc>} {
    %c0 = arith.constant 0 : index
    %c0_0 = arith.constant 0 : index
    %0 = vector.load %arg0[%c0, %c0_0] : memref<8x100xf32, #tpu.memory_space<vmem>>, vector<8x100xf32>
    %c0_1 = arith.constant 0 : index
    %c0_2 = arith.constant 0 : index
    %1 = vector.load %arg1[%c0_1, %c0_2] : memref<100x10xf32, #tpu.memory_space<vmem>>, vector<100x10xf32>
    %cst = arith.constant dense<0.000000e+00> : vector<8x10xf32>
    %2 = tpu.matmul %0, %1, %cst {dimension_numbers = #tpu.dot_dimension_numbers<[1], [0], [0], [1], [0, 0, 1, 1], [], []>} : vector<8x100xf32>, vector<100x10xf32>, vector<8x10xf32> -> vector<8x10xf32>
    %c0_3 = arith.constant 0 : index
    %c0_4 = arith.constant 0 : index
    %3 = vector.load %arg2[%c0_3, %c0_4] : memref<1x10xf32, #tpu.memory_space<vmem>>, vector<1x10xf32>
    %4 = vector.broadcast %3 : vector<1x10xf32> to vector<8x10xf32>
    %5 = arith.addf %2, %4 : vector<8x10xf32>
    %c0_5 = arith.constant 0 : index
    %c0_6 = arith.constant 0 : index
    %6 = vector.load %arg3[%c0_5, %c0_6] : memref<8x10xf32, #tpu.memory_space<vmem>>, vector<8x10xf32>
    tpu.vector_store %arg3[%c0_5, %c0_6], %5 {strides = array<i32>} : memref<8x10xf32, #tpu.memory_space<vmem>>, vector<8x10xf32>,
    return
  }
}

</mosaic_0001>

<bundles_post_ra>
// kernel: musicgen_forward.1
= control target key start
LH: loop header
LB: loop body
LE: loop exit
PB: predicated region body
PF: predicated region fallthrough
CT: control target
= control target key end

     0   :  { %vm40_vm0 = vcmask 1043456   ;;  %v201_v1 = vmov 0.0   ;;  %vm202_vm1 = vmmov 0   ;;  %s272_s0 = inlined_call_operand.vmem [shape: f32[8,100], index: 0, kind: input, shape index: {}]   ;;  %s273_s1 = inlined_call_operand.vmem [shape: f32[100,10], index: 1, kind: input, shape index: {}]   ;;  %s274_s2 = inlined_call_operand.vmem [shape: f32[1,10], index: 2, kind: input, shape index: {}]   ;;  %s275_s3 = inlined_call_operand.hbm [shape: f32[8,10], index: 3, kind: output, shape index: {}]  }
   0x1   :  { %v28_v0 = vld [vmem:[%s273_s1 + $0x60] sm:$0xf]  ;;  %147 = vmatprep.subr.mxu0 %v201_v1  ;;  %v27_v2 = vld [vmem:[%s273_s1 + $0x58] sm:$0xff]  ;;  %173 = vmatprep.mubr.msk.f32.mxu0 %vm202_vm1, %v201_v1  ;;  %v26_v3 = vld [vmem:[%s273_s1 + $0x50] sm:$0xff] }
   0x2   :  { %148 = vmatpush3.msk.msra.mxu0 %vm40_vm0, %v28_v0  ;;  %v25_v4 = vld [vmem:[%s273_s1 + $0x48] sm:$0xff] }
   0x3   :  { %149 = vmatprep.subr.mxu0 %v201_v1 }
   0x4   :  { %150 = vmatpush3.msra.mxu0 %v27_v2 }
   0x5   :  { %151 = vmatprep.subr.mxu0 %v201_v1 }
   0x6   :  { %8 = vsyncpa [#allocation3], 0  ;;  %152 = vmatpush3.msra.mxu0 %v26_v3  ;;  %v24_v5 = vld [vmem:[%s273_s1 + $0x40] sm:$0xff]  ;;  %v23_v6 = vld [vmem:[%s273_s1 + $0x38] sm:$0xff]  ;;  %vm36_vm2 = vcmask 818176   ;;  %s203_s15 = smov [#allocation2]  }
   0x7   :  { %153 = vmatprep.subr.mxu0 %v201_v1  ;;  %v22_v7 = vld [vmem:[%s273_s1 + $0x30] sm:$0xff]  ;;  %v21_v8 = vld [vmem:[%s273_s1 + $0x28] sm:$0xff]  ;;  %v20_v9 = vld [vmem:[%s273_s1 + $0x20] sm:$0xff]  ;;  %s122_s16 = sshll.u32 %s203_s15, 4  ;;  %vm114_vm3 = vcmask 80896   ;;  %s123_s16 = int_to_ptr.vmem [resolvable:$true] %s122_s16 }
   0x8   :  { %154 = vmatpush3.msra.mxu0 %v25_v4  ;;  %v19_v10 = vld [vmem:[%s273_s1 + $0x18] sm:$0xff]  ;;  %v18_v11 = vld [vmem:[%s273_s1 + $0x10] sm:$0xff]  ;;  %v17_v12 = vld [vmem:[%s273_s1 + $0x8] sm:$0xff]  ;;  %p184_p1 = scmp.lt.s32.totalorder %s123_s16, %s123_s16 }
   0x9   :  { %155 = vmatprep.subr.mxu0 %v201_v1  ;;  %v16_v13 = vld [vmem:[%s273_s1] sm:$0xff]  ;;  %s179_s1 = scalar_lea.vmem %s123_s16, 128 }
   0xa   :  { %156 = vmatpush3.msra.mxu0 %v24_v5  ;;  %v15_v14 = vld [vmem:[%s272_s0] sm:$0xff]  ;;  %p180_p0 = scmp.ne.s32.totalorder %s123_s16, %s179_s1  ;;  %p185_p2 = scmp.lt.s32.totalorder %s179_s1, %s179_s1 }
   0xb   :  { %157 = vmatprep.subr.mxu0 %v201_v1  ;;  %v130_v15 = vld [vmem:[%s274_s2] ss:$0 sm:$0xff] }
   0xc   :  { %158 = vmatpush3.msra.mxu0 %v23_v6  ;;  %p186_p3 = por %p185_p2, %p184_p1 }
   0xd   :  { %159 = vmatprep.subr.mxu0 %v201_v1 }
   0xe   :  { %160 = vmatpush3.msra.mxu0 %v22_v7  ;;  %p187_p4 = pnand %p186_p3, %p180_p0 }
   0xf   :  { %161 = vmatprep.subr.mxu0 %v201_v1 }
  0x10   :  { %162 = vmatpush3.msra.mxu0 %v21_v8 }
  0x11   :  { %163 = vmatprep.subr.mxu0 %v201_v1 }
  0x12   :  { %164 = vmatpush3.msra.mxu0 %v20_v9 }
  0x13   :  { %165 = vmatprep.subr.mxu0 %v201_v1 }
  0x14   :  { %166 = vmatpush3.msra.mxu0 %v19_v10 }
  0x15   :  { %167 = vmatprep.subr.mxu0 %v201_v1 }
  0x16   :  { %168 = vmatpush3.msra.mxu0 %v18_v11 }
  0x17   :  { %169 = vmatprep.subr.mxu0 %v201_v1 }
  0x18   :  { %170 = vmatpush3.msra.mxu0 %v17_v12 }
  0x19   :  { %171 = vmatprep.subr.mxu0 %v201_v1 }
  0x1a   :  { %172 = vmatpush3.msra.mxu0 %v16_v13 }
  0x1b   :  { %174 = vmatmul.mubr.msk.f32.vlgmr.msra.gmra.mxu0 %vm36_vm2, %v15_v14 }
  0xdb   :  { %v110_v16 = vpop.f32.mrf.mxu0 }
  0xdc   :  { %v111_v17 = vadd.f32 %v130_v15, %v110_v16 }
  0xdd   :  { %v175_v18 = vpop.f32.mrf.mxu0 }
  0xde   :  { %115 = vst.msk [vmem:[#allocation2] sm:$0xff] %vm114_vm3, %v111_v17 }
  0xdf   :  { %190 = shalt.err (!%p187_p4)
}
  0xe0   :  { %125 = dma.vmem_to_hbm [thread:$0]  %s123_s16, 128, %s275_s3, [#allocation3]  }
  0xe1   :  { %199 = dma.done.wait [#allocation3], 128  }
  0xe2   :  { %200 = vsyncadd [#allocation3], 4294967168 }
  0xe3   :  { %129 = vsyncpa [#allocation3], 1 }

</bundles_post_ra>
